<compile_context>
chip_gen: v5e
topology: v5e:2x2
jax: 0.10.0
libtpu: 0.0.40
codegen_flags: <defaults>
</compile_context>

<pallas_src>
import jax
import jax.numpy as jnp
import numpy as np
from jax.experimental import pallas as pl
from jax.experimental.pallas import tpu as pltpu


# ---------------------------------------------------------------------------
# Kernel: one whole-array HBM -> HBM DMA (identity copy)
# ---------------------------------------------------------------------------
def _identity_dma_kernel(x_hbm, o_hbm, sem):
    copy = pltpu.make_async_copy(x_hbm, o_hbm, sem)
    copy.start()
    copy.wait()


def pallas_identity_copy(x):
    """Materialize a fresh buffer equal to x via a single HBM->HBM DMA."""
    if x.size == 0:
        return x
    return pl.pallas_call(
        _identity_dma_kernel,
        out_shape=jax.ShapeDtypeStruct(x.shape, x.dtype),
        in_specs=[pl.BlockSpec(memory_space=pl.ANY)],   # raw HBM ref, no auto-DMA
        out_specs=pl.BlockSpec(memory_space=pl.ANY),    # raw HBM ref, no auto-DMA
        scratch_shapes=[pltpu.SemaphoreType.DMA],       # DMA-completion semaphore
    )(x)


# ---------------------------------------------------------------------------
# Forward matching the PyTorch module: Identity.forward(x) -> x
# ---------------------------------------------------------------------------
def identity_forward(x, *, materialize=False):
    """Identity: return x.

    Default is the zero-cost short-circuit (no kernel, no HBM traffic).
    Set materialize=True only if a distinct freshly-written output buffer is
    required; that uses the whole-array DMA kernel above.
    """
    if not materialize:
        return x
    return pallas_identity_copy(x)


if __name__ == "__main__":
    key = jax.random.PRNGKey(0)
    k1, k2 = jax.random.split(key)

    # Shape consistent with the module's typical use (NCHW image batch).
    x = jax.random.normal(k1, (2, 4, 16, 16), jnp.float32)

    # Default path: zero-cost identity (no kernel launch).
    y = identity_forward(x)
    jax.block_until_ready(y)
    np.testing.assert_array_equal(np.asarray(y), np.asarray(x))
    assert y.shape == x.shape and y.dtype == x.dtype

    # Materialized path: exercises the Pallas HBM->HBM DMA kernel on TPU.
    y_copy = identity_forward(x, materialize=True)
    jax.block_until_ready(y_copy)
    np.testing.assert_array_equal(np.asarray(y_copy), np.asarray(x))
    assert y_copy.shape == x.shape and y_copy.dtype == x.dtype

    # Ragged / non-aligned shape: whole-array DMA needs no padding or slicing.
    x2 = jax.random.normal(k2, (3, 5, 7), jnp.float32)
    y2 = identity_forward(x2, materialize=True)
    jax.block_until_ready(y2)
    np.testing.assert_array_equal(np.asarray(y2), np.asarray(x2))
    assert y2.shape == x2.shape and y2.dtype == x2.dtype

    print("KERNEL_OK")
</pallas_src>

<mosaic_0001>
module attributes {stable_mosaic.version = 11 : i64} {
  func.func @_identity_dma_kernel(%arg0: memref<2x4x16x16xf32, #tpu.memory_space<any>>, %arg1: memref<2x4x16x16xf32, #tpu.memory_space<any>>, %arg2: memref<!tpu.dma_semaphore, #tpu.memory_space<semaphore_mem>>) attributes {dimension_semantics = [], scalar_prefetch = 0 : i64, scratch_operands = 1 : i64, tpu.core_type = #tpu.core_type<tc>} {
    tpu.enqueue_dma source(%arg0 : memref<2x4x16x16xf32, #tpu.memory_space<any>>) target(%arg1 : memref<2x4x16x16xf32, #tpu.memory_space<any>>) target_semaphore(%arg2 : memref<!tpu.dma_semaphore, #tpu.memory_space<semaphore_mem>>)
    tpu.wait_dma2 semaphore(%arg2 : memref<!tpu.dma_semaphore, #tpu.memory_space<semaphore_mem>>) src(%arg0 : memref<2x4x16x16xf32, #tpu.memory_space<any>>) dst(%arg1 : memref<2x4x16x16xf32, #tpu.memory_space<any>>)
    return
  }
}

</mosaic_0001>

<bundles_post_ra>
// kernel: tpu_custom_call.1
= control target key start
LH: loop header
LB: loop body
LE: loop exit
PB: predicated region body
PF: predicated region fallthrough
CT: control target
= control target key end

     0   :  { %s34_s12 = smov [#allocation2]   ;;  %s35_s13 = smov [#allocation3]   ;;  %s53_s0 = inlined_call_operand.hbm [shape: f32[2,4,16,16], index: 0, kind: input, shape index: {}]   ;;  %s54_s1 = inlined_call_operand.hbm [shape: f32[2,4,16,16], index: 1, kind: output, shape index: {}]  }
   0x1   :  { %s10_s8 = sshll.u32 %s53_s0, 4  ;;  %s12_s11 = sshll.u32 %s54_s1, 4  ;;  %s11_s8 = int_to_ptr.hbm [resolvable:$true] %s10_s8  ;;  %s13_s11 = int_to_ptr.hbm [resolvable:$true] %s12_s11 }
   0x2   :  { %s36_s14 = smov 0  }
   0x3   :  { %16 = dma.general %s11_s8, 2048, %s13_s11, %s34_s12, %s35_s13, [#allocation4], %s36_s14, 0  }
   0x4   :  { %32 = dma.done.wait [#allocation2], 2048 }
   0x5   :  { %33 = vsyncadd [#allocation2], 4294965248 }
   0x6   :  { %22 = vsyncmov [#allocation2] }
   0x9   :  { %s23_s15 = vpop.sfrf %22 }
   0xa   :  { %p28_p0 = scmp.ne.s32.totalorder %s23_s15, 0 }
   0xc   :  { %27 = shalt.err (%p28_p0)  }

</bundles_post_ra>
